<compile_context>
chip_gen: v7x
topology: tpu7x:2x2x1
jax: 0.10.0
libtpu: 0.0.40
codegen_flags: <defaults>
</compile_context>

<pallas_src>
import math
from typing import NamedTuple

import jax
import jax.numpy as jnp
from jax.experimental import pallas as pl
from jax.experimental.pallas import tpu as pltpu


def _round_up(x, m):
    return (x + m - 1) // m * m


_EPS = 1e-8                      # torch.nn.CosineSimilarity default eps
_VMEM_CAP_BYTES = 48 << 20       # keep below v7x's 64 MiB physical VMEM
_VMEM_FLOOR_BYTES = 32 << 20
_FUSED_BUDGET_BYTES = 40 << 20   # use the fused single-call path below this


class PreparedMemory(NamedTuple):
    mem_bf: jax.Array      # (Mp, Fp) bf16, zero padded
    m_norm: jax.Array      # (1, Mp) f32, eps-clamped, padding = 1.0
    num_memories: int
    feature_size: int
    m_pad: int
    f_pad: int
    f_tile: int
    n_ftiles: int


def prepare_memory(memory, *, f_tile=1024):
    """One-time (per parameter update) preprocessing of the memory bank."""
    M, F = memory.shape
    Mp = _round_up(M, 128)
    # cap the F tile so a double-buffered (Mp, Ft) bf16 tile stays <= ~8 MiB
    tile_cap = max(256, ((16 << 20) // (8 * Mp)) // 128 * 128)
    f_tile = max(128, min(f_tile, tile_cap))
    F128 = _round_up(F, 128)
    n_ftiles = -(-F128 // f_tile)
    Ft = _round_up(-(-F128 // n_ftiles), 128)
    Fp = Ft * n_ftiles

    mem_f32 = memory.astype(jnp.float32)
    m_norm = jnp.maximum(
        jnp.sqrt(jnp.sum(mem_f32 * mem_f32, axis=1, keepdims=True)),
        jnp.float32(_EPS)).T                                   # (1, M)
    m_norm = jnp.pad(m_norm, ((0, 0), (0, Mp - M)), constant_values=1.0)
    mem_bf = jnp.pad(mem_f32, ((0, Mp - M), (0, Fp - F))).astype(jnp.bfloat16)
    return PreparedMemory(mem_bf, m_norm, M, F, Mp, Fp, Ft, n_ftiles)


def _vmem_limit(est_bytes):
    return int(min(_VMEM_CAP_BYTES, max(est_bytes + (8 << 20), _VMEM_FLOOR_BYTES)))


def _softmax_mask_weights(dots, znorm, mnorm, lab, num_memories, memory_per_class):
    """Shared epilogue: cosine-normalize, softmax over memories, label masks."""
    bp, mp = dots.shape
    inv_z = pl.reciprocal(znorm, approx=False)                 # (Bp, 1)
    inv_m = pl.reciprocal(mnorm, approx=False)                 # (1, Mp)
    sim = dots * inv_z * inv_m                                 # (Bp, Mp)

    col = jax.lax.broadcasted_iota(jnp.int32, (bp, mp), 1)
    sim = jnp.where(col < num_memories, sim, jnp.float32(-1e30))

    sim_max = jnp.max(sim, axis=-1, keepdims=True)
    e = jnp.exp(sim - sim_max)
    w = e * pl.reciprocal(jnp.sum(e, axis=-1, keepdims=True), approx=False)

    # vectorized label mask: one broadcast range-compare (no per-row unroll)
    lo = lab * memory_per_class                                # (Bp, 1) int32
    m1 = ((col >= lo) & (col < lo + memory_per_class)).astype(jnp.float32)
    mw = w * m1
    mwh = w - mw                                               # == w * (1 - m1)
    return mw, mwh


# -----------------------------------------------------------------------------
# Fused single-call kernel: bank stays VMEM-resident; one pass over HBM.
# -----------------------------------------------------------------------------
def _fused_kernel(memory_per_class, num_memories, b_pad):
    def kernel(z_ref,       # VMEM (Bp, Fp) bf16
               mem_ref,     # VMEM (Mp, Fp) bf16
               mnorm_ref,   # VMEM (1, Mp) f32
               znorm_ref,   # VMEM (Bp, 1) f32
               lab_ref,     # VMEM (Bp, 1) int32
               w_ref,       # out (2*Bp, Mp) f32  [mw ; mwh]
               recon_ref):  # out (2*Bp, Fp) f32
        dots = jax.lax.dot_general(
            z_ref[...], mem_ref[...],
            dimension_numbers=(((1,), (1,)), ((), ())),
            preferred_element_type=jnp.float32)
        mw, mwh = _softmax_mask_weights(dots, znorm_ref[...], mnorm_ref[...],
                                        lab_ref[...], num_memories,
                                        memory_per_class)
        w_ref[pl.ds(0, b_pad), :] = mw
        w_ref[pl.ds(b_pad, b_pad), :] = mwh

        w_bf = jnp.concatenate(
            [mw.astype(jnp.bfloat16), mwh.astype(jnp.bfloat16)], axis=0)
        recon_ref[...] = jnp.dot(w_bf, mem_ref[...],
                                 preferred_element_type=jnp.float32)
    return kernel


# -----------------------------------------------------------------------------
# Tiled pass 1: accumulate dots over F tiles, softmax/mask epilogue.
# -----------------------------------------------------------------------------
def _similarity_kernel(memory_per_class, num_memories, b_pad):
    def kernel(z_ref,       # VMEM (Bp, Ft) bf16
               mem_ref,     # VMEM (Mp, Ft) bf16
               mnorm_ref,   # VMEM (1, Mp) f32
               znorm_ref,   # VMEM (Bp, 1) f32
               lab_ref,     # VMEM (Bp, 1) int32
               w_ref,       # out (2*Bp, Mp) f32
               wbf_ref,     # out (2*Bp, Mp) bf16 (for pass 2)
               acc_ref):    # scratch (Bp, Mp) f32
        j = pl.program_id(0)

        @pl.when(j == 0)
        def _():
            acc_ref[...] = jnp.zeros_like(acc_ref)

        acc_ref[...] += jax.lax.dot_general(
            z_ref[...], mem_ref[...],
            dimension_numbers=(((1,), (1,)), ((), ())),
            preferred_element_type=jnp.float32)

        @pl.when(j == pl.num_programs(0) - 1)
        def _():
            mw, mwh = _softmax_mask_weights(acc_ref[...], znorm_ref[...],
                                            mnorm_ref[...], lab_ref[...],
                                            num_memories, memory_per_class)
            w_ref[pl.ds(0, b_pad), :] = mw
            w_ref[pl.ds(b_pad, b_pad), :] = mwh
            wbf_ref[pl.ds(0, b_pad), :] = mw.astype(jnp.bfloat16)
            wbf_ref[pl.ds(b_pad, b_pad), :] = mwh.astype(jnp.bfloat16)
    return kernel


# -----------------------------------------------------------------------------
# Tiled pass 2: fused reconstructions, one matmul per F tile.
# -----------------------------------------------------------------------------
def _reconstruct_kernel(wbf_ref, mem_ref, out_ref):
    out_ref[...] = jnp.dot(wbf_ref[...], mem_ref[...],
                           preferred_element_type=jnp.float32)


def memory_block_forward(z, lab, prepared: PreparedMemory, num_classes,
                         *, force_tiled=False):
    """Pallas implementation of MemoryBlock.forward (sparse=True path).

    z:        (B, C, H, W) float32
    lab:      (B,) int labels
    prepared: output of prepare_memory(memory)
    Returns (z_hat_target, z_hat_non_target, masked_mem_weight, masked_mem_weight_hat).
    """
    # TODO(synk): non-sparse branch (hardshrink + L1 renormalization) not implemented.
    B, C, H, W = z.shape
    M, F = prepared.num_memories, prepared.feature_size
    assert C * H * W == F
    memory_per_class = M // num_classes
    Mp, Fp, Ft, n_ftiles = (prepared.m_pad, prepared.f_pad,
                            prepared.f_tile, prepared.n_ftiles)
    Bp = _round_up(max(B, 1), 8)

    # ---- per-call (small) activation prep ----
    z_flat = z.reshape(B, F).astype(jnp.float32)
    z_norm = jnp.maximum(
        jnp.sqrt(jnp.sum(z_flat * z_flat, axis=1, keepdims=True)),
        jnp.float32(_EPS))
    z_norm = jnp.pad(z_norm, ((0, Bp - B), (0, 0)), constant_values=1.0)
    z_bf = jnp.pad(z_flat, ((0, Bp - B), (0, Fp - F))).astype(jnp.bfloat16)
    lab_v = jnp.pad(lab.astype(jnp.int32).reshape(B, 1), ((0, Bp - B), (0, 0)))

    fused_est = (2 * (Bp * Fp * 2 + Mp * Fp * 2)          # inputs (2-buffered)
                 + 2 * (2 * Bp * Mp * 4 + 2 * Bp * Fp * 4)  # outputs
                 + Mp * 4 + Bp * 8)
    use_fused = (not force_tiled) and fused_est <= _FUSED_BUDGET_BYTES

    if use_fused:
        w_stack, recon = pl.pallas_call(
            _fused_kernel(memory_per_class, M, Bp),
            out_shape=(jax.ShapeDtypeStruct((2 * Bp, Mp), jnp.float32),
                       jax.ShapeDtypeStruct((2 * Bp, Fp), jnp.float32)),
            grid_spec=pltpu.PrefetchScalarGridSpec(
                num_scalar_prefetch=0,
                grid=(1,),
                in_specs=[
                    pl.BlockSpec((Bp, Fp), lambda i: (0, 0)),    # z
                    pl.BlockSpec((Mp, Fp), lambda i: (0, 0)),    # memory bank
                    pl.BlockSpec((1, Mp), lambda i: (0, 0)),     # m_norm
                    pl.BlockSpec((Bp, 1), lambda i: (0, 0)),     # z_norm
                    pl.BlockSpec((Bp, 1), lambda i: (0, 0)),     # labels
                ],
                out_specs=(pl.BlockSpec((2 * Bp, Mp), lambda i: (0, 0)),
                           pl.BlockSpec((2 * Bp, Fp), lambda i: (0, 0))),
            ),
            compiler_params=pltpu.CompilerParams(
                dimension_semantics=("arbitrary",),
                vmem_limit_bytes=_vmem_limit(fused_est)),
        )(z_bf, prepared.mem_bf, prepared.m_norm, z_norm, lab_v)
    else:
        # ---- pass 1: stacked masked softmax weights (f32 + bf16 copies) ----
        p1_est = (2 * (Bp * Ft * 2 + Mp * Ft * 2 + Mp * 4 + Bp * 8)
                  + 2 * (2 * Bp * Mp * 4 + 2 * Bp * Mp * 2)
                  + Bp * Mp * 4)
        w_stack, w_stack_bf = pl.pallas_call(
            _similarity_kernel(memory_per_class, M, Bp),
            out_shape=(jax.ShapeDtypeStruct((2 * Bp, Mp), jnp.float32),
                       jax.ShapeDtypeStruct((2 * Bp, Mp), jnp.bfloat16)),
            grid_spec=pltpu.PrefetchScalarGridSpec(
                num_scalar_prefetch=0,
                grid=(n_ftiles,),
                in_specs=[
                    pl.BlockSpec((Bp, Ft), lambda j: (0, j)),    # z tile
                    pl.BlockSpec((Mp, Ft), lambda j: (0, j)),    # memory tile
                    pl.BlockSpec((1, Mp), lambda j: (0, 0)),     # m_norm
                    pl.BlockSpec((Bp, 1), lambda j: (0, 0)),     # z_norm
                    pl.BlockSpec((Bp, 1), lambda j: (0, 0)),     # labels
                ],
                out_specs=(pl.BlockSpec((2 * Bp, Mp), lambda j: (0, 0)),
                           pl.BlockSpec((2 * Bp, Mp), lambda j: (0, 0))),
                scratch_shapes=[pltpu.VMEM((Bp, Mp), jnp.float32)],
            ),
            compiler_params=pltpu.CompilerParams(
                dimension_semantics=("arbitrary",),     # F is a reduction axis
                vmem_limit_bytes=_vmem_limit(p1_est)),
        )(z_bf, prepared.mem_bf, prepared.m_norm, z_norm, lab_v)

        # ---- pass 2: fused reconstructions, F axis parallel ----
        p2_est = (2 * (2 * Bp * Mp * 2 + Mp * Ft * 2)
                  + 2 * (2 * Bp * Ft * 4))
        recon = pl.pallas_call(
            _reconstruct_kernel,
            out_shape=jax.ShapeDtypeStruct((2 * Bp, Fp), jnp.float32),
            grid_spec=pltpu.PrefetchScalarGridSpec(
                num_scalar_prefetch=0,
                grid=(n_ftiles,),
                in_specs=[
                    pl.BlockSpec((2 * Bp, Mp), lambda j: (0, 0)),  # bf16 weights
                    pl.BlockSpec((Mp, Ft), lambda j: (0, j)),      # memory tile
                ],
                out_specs=pl.BlockSpec((2 * Bp, Ft), lambda j: (0, j)),
            ),
            compiler_params=pltpu.CompilerParams(
                dimension_semantics=("parallel",),
                vmem_limit_bytes=_vmem_limit(p2_est)),
        )(w_stack_bf, prepared.mem_bf)

    z_hat_target = recon[:B, :F].reshape(B, C, H, W)
    z_hat_non_target = recon[Bp:Bp + B, :F].reshape(B, C, H, W)
    masked_mem_weight = w_stack[:B, :M]
    masked_mem_weight_hat = w_stack[Bp:Bp + B, :M]
    return z_hat_target, z_hat_non_target, masked_mem_weight, masked_mem_weight_hat


def init_memory(key, num_memories, feature_size):
    """Deterministic kaiming_uniform_ equivalent (fan_in = feature_size)."""
    bound = math.sqrt(6.0 / feature_size)
    return jax.random.uniform(key, (num_memories, feature_size),
                              minval=-bound, maxval=bound, dtype=jnp.float32)


if __name__ == "__main__":
    # small shapes consistent with the module
    B, C, H, W = 2, 4, 16, 16
    F = C * H * W                 # feature_size = 1024
    NUM_MEMORIES = 64
    NUM_CLASSES = 8               # memoryPerClass = 8

    key = jax.random.PRNGKey(0)
    k_mem, k_z, k_lab = jax.random.split(key, 3)

    memory = init_memory(k_mem, NUM_MEMORIES, F)
    z = jax.random.normal(k_z, (B, C, H, W), dtype=jnp.float32)
    lab = jax.random.randint(k_lab, (B,), 0, NUM_CLASSES, dtype=jnp.int32)

    # pure-JAX f32 reference (same semantics as the torch module, sparse=True)
    zf = z.reshape(B, F)
    zn = jnp.maximum(jnp.linalg.norm(zf, axis=1, keepdims=True), 1e-8)
    mn = jnp.maximum(jnp.linalg.norm(memory, axis=1, keepdims=True), 1e-8)
    sim_ref = (zf @ memory.T) / (zn * mn.T)
    w_ref = jax.nn.softmax(sim_ref, axis=1)
    mpc = NUM_MEMORIES // NUM_CLASSES
    ids = jnp.arange(NUM_MEMORIES)[None, :] // mpc
    m1_ref = (ids == lab[:, None]).astype(jnp.float32)
    mw_ref = w_ref * m1_ref
    mwh_ref = w_ref * (1.0 - m1_ref)
    zt_ref = (mw_ref @ memory).reshape(B, C, H, W)
    znt_ref = (mwh_ref @ memory).reshape(B, C, H, W)

    def check(outs):
        z_hat_t, z_hat_nt, mw, mwh = outs
        assert z_hat_t.shape == (B, C, H, W)
        assert z_hat_nt.shape == (B, C, H, W)
        assert mw.shape == (B, NUM_MEMORIES)
        assert mwh.shape == (B, NUM_MEMORIES)
        # loose tolerances: bf16 matmul operands
        assert jnp.allclose(mw, mw_ref, atol=1e-4, rtol=1e-2)
        assert jnp.allclose(mwh, mwh_ref, atol=1e-4, rtol=1e-2)
        assert jnp.allclose(z_hat_t, zt_ref, atol=5e-4, rtol=5e-2)
        assert jnp.allclose(z_hat_nt, znt_ref, atol=5e-4, rtol=5e-2)

    # 1) fused single-call path (bank fits VMEM) — default for small problems
    prepared = prepare_memory(memory)              # hoisted, done once per param
    outs = memory_block_forward(z, lab, prepared, NUM_CLASSES)
    jax.block_until_ready(outs)
    check(outs)

    # 2) tiled two-pass fallback path (forced, 4 F-tiles) — large-problem codepath
    prepared_t = prepare_memory(memory, f_tile=256)
    outs_t = memory_block_forward(z, lab, prepared_t, NUM_CLASSES, force_tiled=True)
    jax.block_until_ready(outs_t)
    check(outs_t)

    print("KERNEL_OK")
</pallas_src>

<mosaic_0001>
module attributes {stable_mosaic.version = 11 : i64} {
  func.func @kernel(%arg0: i32, %arg1: memref<8x1024xbf16, #tpu.memory_space<vmem>>, %arg2: memref<128x1024xbf16, #tpu.memory_space<vmem>>, %arg3: memref<1x128xf32, #tpu.memory_space<vmem>>, %arg4: memref<8x1xf32, #tpu.memory_space<vmem>>, %arg5: memref<8x1xi32, #tpu.memory_space<vmem>>, %arg6: memref<16x128xf32, #tpu.memory_space<vmem>>, %arg7: memref<16x1024xf32, #tpu.memory_space<vmem>>) attributes {dimension_semantics = [#tpu.dimension_semantics<arbitrary>], iteration_bounds = array<i64: 1>, scalar_prefetch = 0 : i64, scratch_operands = 0 : i64, tpu.core_type = #tpu.core_type<tc>, window_params = [{pipeline_mode = #tpu.pipeline_mode<synchronous>, transform_indices = @transform_0, window_bounds = array<i64: 8, 1024>}, {pipeline_mode = #tpu.pipeline_mode<synchronous>, transform_indices = @transform_1, window_bounds = array<i64: 128, 1024>}, {pipeline_mode = #tpu.pipeline_mode<synchronous>, transform_indices = @transform_2, window_bounds = array<i64: 1, 128>}, {pipeline_mode = #tpu.pipeline_mode<synchronous>, transform_indices = @transform_3, window_bounds = array<i64: 8, 1>}, {pipeline_mode = #tpu.pipeline_mode<synchronous>, transform_indices = @transform_4, window_bounds = array<i64: 8, 1>}, {pipeline_mode = #tpu.pipeline_mode<synchronous>, transform_indices = @transform_5, window_bounds = array<i64: 16, 128>}, {pipeline_mode = #tpu.pipeline_mode<synchronous>, transform_indices = @transform_6, window_bounds = array<i64: 16, 1024>}]} {
    %c0 = arith.constant 0 : index
    %c0_0 = arith.constant 0 : index
    %0 = vector.load %arg1[%c0, %c0_0] : memref<8x1024xbf16, #tpu.memory_space<vmem>>, vector<8x1024xbf16>
    %c0_1 = arith.constant 0 : index
    %c0_2 = arith.constant 0 : index
    %1 = vector.load %arg2[%c0_1, %c0_2] : memref<128x1024xbf16, #tpu.memory_space<vmem>>, vector<128x1024xbf16>
    %cst = arith.constant dense<0.000000e+00> : vector<8x128xf32>
    %2 = tpu.matmul %0, %1, %cst {dimension_numbers = #tpu.dot_dimension_numbers<[1], [1], [0], [0], [0, 0, 1, 0], [], []>} : vector<8x1024xbf16>, vector<128x1024xbf16>, vector<8x128xf32> -> vector<8x128xf32>
    %c0_3 = arith.constant 0 : index
    %c0_4 = arith.constant 0 : index
    %3 = vector.load %arg4[%c0_3, %c0_4] : memref<8x1xf32, #tpu.memory_space<vmem>>, vector<8x1xf32>
    %c0_5 = arith.constant 0 : index
    %c0_6 = arith.constant 0 : index
    %4 = vector.load %arg3[%c0_5, %c0_6] : memref<1x128xf32, #tpu.memory_space<vmem>>, vector<1x128xf32>
    %c0_7 = arith.constant 0 : index
    %c0_8 = arith.constant 0 : index
    %5 = vector.load %arg5[%c0_7, %c0_8] : memref<8x1xi32, #tpu.memory_space<vmem>>, vector<8x1xi32>
    %6 = tpu.reciprocal %3 : vector<8x1xf32> -> vector<8x1xf32>
    %7 = tpu.reciprocal %4 : vector<1x128xf32> -> vector<1x128xf32>
    %8 = vector.broadcast %6 : vector<8x1xf32> to vector<8x128xf32>
    %9 = arith.mulf %2, %8 : vector<8x128xf32>
    %10 = vector.broadcast %7 : vector<1x128xf32> to vector<8x128xf32>
    %11 = arith.mulf %9, %10 : vector<8x128xf32>
    %12 = tpu.iota {dimensions = array<i32: 1>} : vector<8x128xi32>
    %c64_i32 = arith.constant 64 : i32
    %13 = vector.broadcast %c64_i32 : i32 to vector<8x128xi32>
    %14 = arith.cmpi slt, %12, %13 : vector<8x128xi32>
    %cst_9 = arith.constant -1.000000e+30 : f32
    %15 = vector.broadcast %cst_9 : f32 to vector<8x128xf32>
    %16 = arith.select %14, %11, %15 : vector<8x128xi1>, vector<8x128xf32>
    %cst_10 = arith.constant dense<0xFF800000> : vector<8xf32>
    %17 = vector.multi_reduction <maximumf>, %16, %cst_10 [1] : vector<8x128xf32> to vector<8xf32>
    %18 = vector.shape_cast %17 : vector<8xf32> to vector<8x1xf32>
    %19 = vector.broadcast %18 : vector<8x1xf32> to vector<8x128xf32>
    %20 = arith.subf %16, %19 : vector<8x128xf32>
    %21 = math.exp %20 : vector<8x128xf32>
    %cst_11 = arith.constant dense<0.000000e+00> : vector<8xf32>
    %22 = vector.multi_reduction <add>, %21, %cst_11 [1] : vector<8x128xf32> to vector<8xf32>
    %23 = vector.shape_cast %22 : vector<8xf32> to vector<8x1xf32>
    %24 = tpu.reciprocal %23 : vector<8x1xf32> -> vector<8x1xf32>
    %25 = vector.broadcast %24 : vector<8x1xf32> to vector<8x128xf32>
    %26 = arith.mulf %21, %25 : vector<8x128xf32>
    %c8_i32 = arith.constant 8 : i32
    %27 = vector.broadcast %c8_i32 : i32 to vector<8x1xi32>
    %28 = arith.muli %5, %27 : vector<8x1xi32>
    %29 = vector.broadcast %28 : vector<8x1xi32> to vector<8x128xi32>
    %30 = arith.cmpi sge, %12, %29 : vector<8x128xi32>
    %c8_i32_12 = arith.constant 8 : i32
    %31 = vector.broadcast %c8_i32_12 : i32 to vector<8x1xi32>
    %32 = arith.addi %28, %31 : vector<8x1xi32>
    %33 = vector.broadcast %32 : vector<8x1xi32> to vector<8x128xi32>
    %34 = arith.cmpi slt, %12, %33 : vector<8x128xi32>
    %35 = arith.andi %30, %34 : vector<8x128xi1>
    %36 = arith.extui %35 : vector<8x128xi1> to vector<8x128xi32>
    %37 = arith.sitofp %36 : vector<8x128xi32> to vector<8x128xf32>
    %38 = arith.mulf %26, %37 : vector<8x128xf32>
    %39 = arith.subf %26, %38 : vector<8x128xf32>
    %c0_13 = arith.constant 0 : index
    %c0_14 = arith.constant 0 : index
    %40 = vector.load %arg6[%c0_13, %c0_14] : memref<16x128xf32, #tpu.memory_space<vmem>>, vector<8x128xf32>
    tpu.vector_store %arg6[%c0_13, %c0_14], %38 {strides = array<i32>} : memref<16x128xf32, #tpu.memory_space<vmem>>, vector<8x128xf32>,
    %c8 = arith.constant 8 : index
    %c0_15 = arith.constant 0 : index
    %41 = vector.load %arg6[%c8, %c0_15] : memref<16x128xf32, #tpu.memory_space<vmem>>, vector<8x128xf32>
    tpu.vector_store %arg6[%c8, %c0_15], %39 {strides = array<i32>} : memref<16x128xf32, #tpu.memory_space<vmem>>, vector<8x128xf32>,
    %42 = arith.truncf %38 : vector<8x128xf32> to vector<8x128xbf16>
    %43 = arith.truncf %39 : vector<8x128xf32> to vector<8x128xbf16>
    %44 = tpu.concatenate %42, %43 in 0 : vector<8x128xbf16>, vector<8x128xbf16> -> vector<16x128xbf16>
    %c0_16 = arith.constant 0 : index
    %c0_17 = arith.constant 0 : index
    %45 = vector.load %arg2[%c0_16, %c0_17] : memref<128x1024xbf16, #tpu.memory_space<vmem>>, vector<128x1024xbf16>
    %cst_18 = arith.constant dense<0.000000e+00> : vector<16x1024xf32>
    %46 = tpu.matmul %44, %45, %cst_18 {dimension_numbers = #tpu.dot_dimension_numbers<[1], [0], [0], [1], [0, 0, 1, 1], [], []>} : vector<16x128xbf16>, vector<128x1024xbf16>, vector<16x1024xf32> -> vector<16x1024xf32>
    %c0_19 = arith.constant 0 : index
    %c0_20 = arith.constant 0 : index
    %47 = vector.load %arg7[%c0_19, %c0_20] : memref<16x1024xf32, #tpu.memory_space<vmem>>, vector<16x1024xf32>
    tpu.vector_store %arg7[%c0_19, %c0_20], %46 {strides = array<i32>} : memref<16x1024xf32, #tpu.memory_space<vmem>>, vector<16x1024xf32>,
    return
  }
  func.func @transform_0(%arg0: i32) -> (i32, i32) {
    %c0_i32 = arith.constant 0 : i32
    %c0_i32_0 = arith.constant 0 : i32
    %c0_i32_1 = arith.constant 0 : i32
    return %c0_i32, %c0_i32_0 : i32, i32
  }
  func.func @transform_1(%arg0: i32) -> (i32, i32) {
    %c0_i32 = arith.constant 0 : i32
    %c0_i32_0 = arith.constant 0 : i32
    %c0_i32_1 = arith.constant 0 : i32
    return %c0_i32, %c0_i32_0 : i32, i32
  }
  func.func @transform_2(%arg0: i32) -> (i32, i32) {
    %c0_i32 = arith.constant 0 : i32
    %c0_i32_0 = arith.constant 0 : i32
    %c0_i32_1 = arith.constant 0 : i32
    return %c0_i32, %c0_i32_0 : i32, i32
  }
  func.func @transform_3(%arg0: i32) -> (i32, i32) {
    %c0_i32 = arith.constant 0 : i32
    %c0_i32_0 = arith.constant 0 : i32
    %c0_i32_1 = arith.constant 0 : i32
    return %c0_i32, %c0_i32_0 : i32, i32
  }
  func.func @transform_4(%arg0: i32) -> (i32, i32) {
    %c0_i32 = arith.constant 0 : i32
    %c0_i32_0 = arith.constant 0 : i32
    %c0_i32_1 = arith.constant 0 : i32
    return %c0_i32, %c0_i32_0 : i32, i32
  }
  func.func @transform_5(%arg0: i32) -> (i32, i32) {
    %c0_i32 = arith.constant 0 : i32
    %c0_i32_0 = arith.constant 0 : i32
    %c0_i32_1 = arith.constant 0 : i32
    return %c0_i32, %c0_i32_0 : i32, i32
  }
  func.func @transform_6(%arg0: i32) -> (i32, i32) {
    %c0_i32 = arith.constant 0 : i32
    %c0_i32_0 = arith.constant 0 : i32
    %c0_i32_1 = arith.constant 0 : i32
    return %c0_i32, %c0_i32_0 : i32, i32
  }
}

</mosaic_0001>

<bundles_post_ra>
// kernel: tpu_custom_call.1
= control target key start
LH: loop header
LB: loop body
LE: loop exit
PB: predicated region body
PF: predicated region fallthrough
CT: control target
= control target key end

     0   :  { %12 = vsyncpa [#allocation3], 0  ;;  %s1943_s0 = inlined_call_operand.hbm [shape: bf16[8,1024], index: 0, kind: input, shape index: {}]   ;;  %s1944_s1 = inlined_call_operand.hbm [shape: bf16[128,1024], index: 1, kind: input, shape index: {}]   ;;  %s1945_s2 = inlined_call_operand.vmem [shape: f32[1,128], index: 2, kind: input, shape index: {}]   ;;  %s1946_s3 = inlined_call_operand.vmem [shape: f32[8,1], index: 3, kind: input, shape index: {}]   ;;  %s1947_s4 = inlined_call_operand.vmem [shape: s32[8,1], index: 4, kind: input, shape index: {}]   ;;  %s1948_s5 = inlined_call_operand.hbm [shape: f32[16,128], index: 5, kind: output, shape index: {0}]   ;;  %s1949_s6 = inlined_call_operand.hbm [shape: f32[16,1024], index: 6, kind: output, shape index: {1}]  }
   0x1   :  { %13 = vsyncpa [#allocation6], 0 }
   0x2   :  { %14 = vsyncpa [#allocation4], 0 }
   0x3   :  { %15 = vsyncpa [#allocation9], 0  ;;  %s1562_s21 = smov [#allocation2]   ;;  %s1563_s23 = smov [#allocation5]  }
   0x4   :  { %s22_s22 = sshll.u32 %s1562_s21, 4  ;;  %s31_s24 = sshll.u32 %s1563_s23, 4  ;;  %s23_s22 = int_to_ptr.vmem [resolvable:$true] %s22_s22  ;;  %s1609_s24 = int_to_ptr.vmem [resolvable:$true] %s31_s24 }
   0x5   :  { %s1466_s27 = scalar_lea.hbm %s1943_s0, 512 }
   0x6   :  { %p1467_p0 = scmp.ne.s32.totalorder %s1943_s0, %s1466_s27  ;;  %p1470_p1 = scmp.lt.u32.totalorder %s1466_s27, %s1943_s0 }
   0x8   :  { %p1472_p2 = pnand %p1470_p1, %p1467_p0 }
   0xa   :  { %1475 = shalt.err (!%p1472_p2)
}
   0xb   :  { %s1476_s8 = scalar_lea.vmem %s23_s22, 512  ;;  %p1481_p4 = scmp.lt.s32.totalorder %s23_s22, %s23_s22 }
   0xc   :  { %p1477_p3 = scmp.ne.s32.totalorder %s23_s22, %s1476_s8  ;;  %p1482_p5 = scmp.lt.s32.totalorder %s1476_s8, %s1476_s8 }
   0xe   :  { %p1483_p6 = por %p1482_p5, %p1481_p4 }
  0x10   :  { %p1484_p7 = pnand %p1483_p6, %p1477_p3 }
  0x12   :  { %1487 = shalt.err (!%p1484_p7)
}
  0x13   :  { %25 = dma.hbm_to_vmem [thread:$0]  %s1943_s0, 512, %s23_s22, [#allocation3]  }
  0x14   :  { %s1488_s13 = scalar_lea.hbm %s1944_s1, 8192 }
  0x15   :  { %p1489_p8 = scmp.ne.s32.totalorder %s1944_s1, %s1488_s13  ;;  %p1492_p9 = scmp.lt.u32.totalorder %s1488_s13, %s1944_s1 }
  0x17   :  { %p1494_p10 = pnand %p1492_p9, %p1489_p8 }
  0x19   :  { %1497 = shalt.err (!%p1494_p10)
}
  0x1a   :  { %s1498_s18 = scalar_lea.vmem %s1609_s24, 8192  ;;  %p1503_p12 = scmp.lt.s32.totalorder %s1609_s24, %s1609_s24 }
  0x1b   :  { %p1499_p11 = scmp.ne.s32.totalorder %s1609_s24, %s1498_s18  ;;  %p1504_p13 = scmp.lt.s32.totalorder %s1498_s18, %s1498_s18 }
  0x1d   :  { %p1505_p0 = por %p1504_p13, %p1503_p12 }
  0x1f   :  { %p1506_p1 = pnand %p1505_p0, %p1499_p11 }
  0x21   :  { %1509 = shalt.err (!%p1506_p1)
}
  0x22   :  { %s1564_s0 = smov 512   ;;  %s1565_s19 = smov 32  }
  0x23   :  { %37 = dma.hbm_to_vmem [thread:$0]  %s1944_s1, 8192, %s1609_s24, [#allocation6], %s1564_s0, %s1564_s0, %s1565_s19  }
  0x24   :  { %1554 = dma.done.wait [#allocation3], 512  }
  0x25   :  { %1555 = vsyncadd [#allocation3], 4294966784 }
  0x26   :  { %1556 = dma.done.wait [#allocation6], 8192  }
  0x27   :  { %1557 = vsyncadd [#allocation6], 4294959104  ;;  %v56_v0 = vld [vmem:[#allocation5 + $0x8] sm:$0xff]  ;;  %v55_v13 = vld [vmem:[#allocation5] sm:$0xff]  ;;  %vm679_vm4 = vcmask 1043456  }
  0x28   :  { %v60_v1 = vld [vmem:[#allocation5 + $0x28] sm:$0xff]  ;;  %v59_v14 = vld [vmem:[#allocation5 + $0x20] sm:$0xff]  ;;  %v57_v60 = vld [vmem:[#allocation5 + $0x10] sm:$0xff] }
  0x29   :  { %v64_v2 = vld [vmem:[#allocation5 + $0x48] sm:$0xff]  ;;  %v1640_v3 = vcombine.high %v56_v0, %v60_v1  ;;  %v1642_v4 = vcombine.low %v56_v0, %v60_v1  ;;  %v1658_v15 = vcombine.high %v55_v13, %v59_v14  ;;  %v1660_v16 = vcombine.low %v55_v13, %v59_v14  ;;  %v63_v17 = vld [vmem:[#allocation5 + $0x40] sm:$0xff]  ;;  %v61_v61 = vld [vmem:[#allocation5 + $0x30] sm:$0xff] }
  0x2a   :  { %v68_v5 = vld [vmem:[#allocation5 + $0x68] sm:$0xff]  ;;  %v67_v18 = vld [vmem:[#allocation5 + $0x60] sm:$0xff]  ;;  %v1730_v63 = vcombine.high %v57_v60, %v61_v61  ;;  %v65_v13 = vld [vmem:[#allocation5 + $0x50] sm:$0xff] }
  0x2b   :  { %v1644_v6 = vcombine.high %v64_v2, %v68_v5  ;;  %507 = vmatprep.subr.bf16.mxu0 %v1640_v3  ;;  %v1649_v7 = vld [vmem:[#allocation2 + $0x8] sm:$0xff]  ;;  %v1653_v11 = vcombine.low %v64_v2, %v68_v5  ;;  %467 = vmatprep.subr.bf16.mxu1 %v1658_v15  ;;  %v1664_v21 = vcombine.high %v63_v17, %v67_v18  ;;  %v71_v24 = vld [vmem:[#allocation5 + $0x80] sm:$0xff]  ;;  %v69_v14 = vld [vmem:[#allocation5 + $0x70] sm:$0xff] }
  0x2c   :  { %508 = vmatpush1.bf16.xpose.msra.mxu0 %v1642_v4  ;;  %v72_v8 = vld [vmem:[#allocation5 + $0x88] sm:$0xff]  ;;  %v1293_v10 = vcombine.high %v1649_v7, %v1649_v7  ;;  %468 = vmatpush1.bf16.xpose.msra.mxu1 %v1660_v16  ;;  %v75_v25 = vld [vmem:[#allocation5 + $0xa0] sm:$0xff]  ;;  %v1672_v26 = vcombine.low %v63_v17, %v67_v18  ;;  %v1292_v17 = vcombine.low %v1649_v7, %v1649_v7  ;;  %v1950_v7 = vmov 0  }
  0x2d   :  { %509 = vmatprep.subr.bf16.mxu0 %v1644_v6  ;;  %v76_v9 = vld [vmem:[#allocation5 + $0xa8] sm:$0xff]  ;;  %469 = vmatprep.subr.bf16.mxu1 %v1664_v21  ;;  %v1675_v27 = vcombine.high %v71_v24, %v75_v25  ;;  %v79_v32 = vld [vmem:[#allocation5 + $0xc0] sm:$0xff]  ;;  %v1684_v34 = vcombine.low %v71_v24, %v75_v25  ;;  %v1743_v18 = vcombine.low %v57_v60, %v61_v61  ;;  %v66_v61 = vld [vmem:[#allocation5 + $0x58] sm:$0xff] }
  0x2e   :  { %539 = vmatprep.mubr.bf16.mxu0 %v1293_v10  ;;  %v1655_v12 = vcombine.high %v72_v8, %v76_v9  ;;  %v80_v19 = vld [vmem:[#allocation5 + $0xc8] sm:$0xff]  ;;  %v1667_v22 = vcombine.low %v72_v8, %v76_v9  ;;  %v83_v33 = vld [vmem:[#allocation5 + $0xe0] sm:$0xff]  ;;  %v1738_v9 = vld [vmem:[#allocation2 + $0x10] sm:$0xff]  ;;  %1448 = vset.pattern.permute.xlu0 %v1950_v7 }
  0x2f   :  { %v84_v20 = vld [vmem:[#allocation5 + $0xe8] sm:$0xff]  ;;  %v1687_v35 = vcombine.high %v79_v32, %v83_v33  ;;  %v87_v40 = vld [vmem:[#allocation5 + $0x100] sm:$0xff]  ;;  %v1696_v42 = vcombine.low %v79_v32, %v83_v33  ;;  %1449 = vset.pattern.permute.xlu1 %v1950_v7  ;;  %v1757_v32 = vcombine.low %v65_v13, %v69_v14 }
  0x30   :  { %v1670_v23 = vcombine.high %v80_v19, %v84_v20  ;;  %v88_v28 = vld [vmem:[#allocation5 + $0x108] sm:$0xff]  ;;  %v1679_v30 = vcombine.low %v80_v19, %v84_v20  ;;  %v91_v41 = vld [vmem:[#allocation5 + $0x120] sm:$0xff]  ;;  %v1295_v19 = vcombine.high %v1738_v9, %v1738_v9  ;;  %v1748_v20 = vcombine.high %v65_v13, %v69_v14  ;;  %v78_v13 = vld [vmem:[#allocation5 + $0xb8] sm:$0xff] }
  0x31   :  { %v92_v29 = vld [vmem:[#allocation5 + $0x128] sm:$0xff]  ;;  %v1699_v43 = vcombine.high %v87_v40, %v91_v41  ;;  %v95_v48 = vld [vmem:[#allocation5 + $0x140] sm:$0xff]  ;;  %v1708_v50 = vcombine.low %v87_v40, %v91_v41  ;;  %v81_v40 = vld [vmem:[#allocation5 + $0xd0] sm:$0xff] }
  0x32   :  { %v1682_v31 = vcombine.high %v88_v28, %v92_v29  ;;  %v96_v36 = vld [vmem:[#allocation5 + $0x148] sm:$0xff]  ;;  %v1691_v38 = vcombine.low %v88_v28, %v92_v29  ;;  %v99_v49 = vld [vmem:[#allocation5 + $0x160] sm:$0xff]  ;;  %v73_v28 = vld [vmem:[#allocation5 + $0x90] sm:$0xff] }
  0x33   :  { %v100_v37 = vld [vmem:[#allocation5 + $0x168] sm:$0xff]  ;;  %v1711_v51 = vcombine.high %v95_v48, %v99_v49  ;;  %v103_v56 = vld [vmem:[#allocation5 + $0x180] sm:$0xff]  ;;  %v1720_v58 = vcombine.low %v95_v48, %v99_v49  ;;  %v77_v29 = vld [vmem:[#allocation5 + $0xb0] sm:$0xff] }
  0x34   :  { %510 = vmatpush1.bf16.xpose.msra.mxu0 %v1653_v11  ;;  %470 = vmatpush1.bf16.xpose.msra.mxu1 %v1672_v26  ;;  %v1694_v39 = vcombine.high %v96_v36, %v100_v37  ;;  %v104_v44 = vld [vmem:[#allocation5 + $0x188] sm:$0xff]  ;;  %v1703_v46 = vcombine.low %v96_v36, %v100_v37  ;;  %v107_v57 = vld [vmem:[#allocation5 + $0x1a0] sm:$0xff]  ;;  %v1760_v33 = vcombine.high %v73_v28, %v77_v29  ;;  %v85_v41 = vld [vmem:[#allocation5 + $0xf0] sm:$0xff] }
  0x35   :  { %511 = vmatprep.subr.bf16.mxu0 %v1655_v12  ;;  %471 = vmatprep.subr.bf16.mxu1 %v1675_v27  ;;  %v108_v45 = vld [vmem:[#allocation5 + $0x1a8] sm:$0xff]  ;;  %v1723_v59 = vcombine.high %v103_v56, %v107_v57  ;;  %v111_v0 = vld [vmem:[#allocation5 + $0x1c0] sm:$0xff]  ;;  %v1732_v2 = vcombine.low %v103_v56, %v107_v57  ;;  %v93_v48 = vld [vmem:[#allocation5 + $0x130] sm:$0xff] }
  0x36   :  { %v1706_v47 = vcombine.high %v104_v44, %v108_v45  ;;  %v112_v52 = vld [vmem:[#allocation5 + $0x1c8] sm:$0xff]  ;;  %v1715_v54 = vcombine.low %v104_v44, %v108_v45  ;;  %v115_v1 = vld [vmem:[#allocation5 + $0x1e0] sm:$0xff]  ;;  %v1765_v44 = vcombine.low %v73_v28, %v77_v29  ;;  %v89_v45 = vld [vmem:[#allocation5 + $0x110] sm:$0xff] }
  0x37   :  { %v116_v53 = vld [vmem:[#allocation5 + $0x1e8] sm:$0xff]  ;;  %v1735_v5 = vcombine.high %v111_v0, %v115_v1  ;;  %v51_v8 = vld [vmem:[#allocation2] sm:$0xff]  ;;  %v1354_v24 = vcombine.low %v111_v0, %v115_v1  ;;  %v1786_v49 = vcombine.low %v89_v45, %v93_v48  ;;  %v58_v57 = vld [vmem:[#allocation5 + $0x18] sm:$0xff]  ;;  %v1294_v1 = vcombine.low %v1738_v9, %v1738_v9 }
  0x38   :  { %v1718_v55 = vcombine.high %v112_v52, %v116_v53  ;;  %v1727_v62 = vcombine.low %v112_v52, %v116_v53  ;;  %v1291_v10 = vcombine.high %v51_v8, %v51_v8  ;;  %v627_v25 = vld [vmem:[%s1946_s3] sm:$0xff]  ;;  %v1290_v36 = vcombine.low %v51_v8, %v51_v8  ;;  %v117_v52 = vld [vmem:[#allocation5 + $0x1f0] sm:$0xff]  ;;  %v70_v0 = vld [vmem:[#allocation5 + $0x78] sm:$0xff] }
  0x39   :  { %1458 = vrcp.f32 %v627_v25  ;;  %v1820_v8 = vcombine.high %v66_v61, %v70_v0  ;;  %v1824_v14 = vcombine.low %v66_v61, %v70_v0  ;;  %v82_v9 = vld [vmem:[#allocation5 + $0xd8] sm:$0xff] }
  0x3a   :  { %499 = vmatprep.mubr.bf16.mxu1 %v1291_v10  ;;  %v74_v10 = vld [vmem:[#allocation5 + $0x98] sm:$0xff] }
  0x3b   :  { %v90_v28 = vld [vmem:[#allocation5 + $0x118] sm:$0xff] }
  0x3c   :  { %512 = vmatpush1.bf16.xpose.msra.mxu0 %v1667_v22  ;;  %472 = vmatpush1.bf16.xpose.msra.mxu1 %v1684_v34  ;;  %v94_v29 = vld [vmem:[#allocation5 + $0x138] sm:$0xff] }
  0x3d   :  { %513 = vmatprep.subr.bf16.mxu0 %v1670_v23  ;;  %473 = vmatprep.subr.bf16.mxu1 %v1687_v35 }
  0x43   :  { %v1459_v37 = vpop.eup %1458 }
  0x44   :  { %514 = vmatpush1.bf16.xpose.msra.mxu0 %v1679_v30  ;;  %474 = vmatpush1.bf16.xpose.msra.mxu1 %v1696_v42 }
  0x45   :  { %515 = vmatprep.subr.bf16.mxu0 %v1682_v31  ;;  %475 = vmatprep.subr.bf16.mxu1 %v1699_v43 }
  0x46   :  { %634 = vperm.xlu0 %1448, %v1459_v37   ;;  %v1838_v37 = vcombine.high %v90_v28, %v94_v29 }
  0x4c   :  { %516 = vmatpush1.bf16.xpose.msra.mxu0 %v1691_v38  ;;  %476 = vmatpush1.bf16.xpose.msra.mxu1 %v1708_v50 }
  0x4d   :  { %517 = vmatprep.subr.bf16.mxu0 %v1694_v39  ;;  %477 = vmatprep.subr.bf16.mxu1 %v1711_v51 }
  0x54   :  { %518 = vmatpush1.bf16.xpose.msra.mxu0 %v1703_v46  ;;  %478 = vmatpush1.bf16.xpose.msra.mxu1 %v1720_v58 }
  0x55   :  { %519 = vmatprep.subr.bf16.mxu0 %v1706_v47  ;;  %479 = vmatprep.subr.bf16.mxu1 %v1723_v59 }
  0x5c   :  { %520 = vmatpush1.bf16.xpose.msra.mxu0 %v1715_v54  ;;  %480 = vmatpush1.bf16.xpose.msra.mxu1 %v1732_v2 }
  0x5d   :  { %521 = vmatprep.subr.bf16.mxu0 %v1718_v55  ;;  %481 = vmatprep.subr.bf16.mxu1 %v1735_v5 }
  0x64   :  { %522 = vmatpush1.bf16.xpose.msra.mxu0 %v1727_v62  ;;  %482 = vmatpush1.bf16.xpose.msra.mxu1 %v1354_v24 }
  0x65   :  { %547 = vmatprep.subr.bf16.mxu0 %v1730_v63  ;;  %1068 = vmatprep.subr.bf16.mxu1 %v1658_v15  ;;  %v1769_v15 = vcombine.high %v81_v40, %v85_v41 }
  0x6b   :  { %540 = vmatmul.mubr.bf16.vlgmr.msra.gmra.mrb[0].mxu0 %v1292_v17  ;;  %500 = vmatmul.mubr.bf16.vlgmr.msra.gmra.mrb[0].mxu1 %v1290_v36  ;;  %v1826_v17 = vcombine.high %v74_v10, %v78_v13 }
  0x6c   :  { %548 = vmatpush1.bf16.xpose.msra.mxu0 %v1743_v18  ;;  %579 = vmatprep.mubr.bf16.mxu0 %v1295_v19  ;;  %v86_v19 = vld [vmem:[#allocation5 + $0xf8] sm:$0xff] }
  0x6d   :  { %549 = vmatprep.subr.bf16.mxu0 %v1748_v20  ;;  %1069 = vmatpush1.bf16.msra.mxu1 %v1660_v16  ;;  %v1776_v16 = vcombine.low %v81_v40, %v85_v41  ;;  %v1832_v25 = vcombine.high %v82_v9, %v86_v19  ;;  %v1836_v36 = vcombine.low %v82_v9, %v86_v19  ;;  %v98_v40 = vld [vmem:[#allocation5 + $0x158] sm:$0xff] }
  0x6e   :  { %1070 = vmatprep.subr.bf16.mxu1 %v1664_v21  ;;  %1100 = vmatprep.mubr.bf16.mxu1 %v1950_v7  ;;  %v1779_v21 = vcombine.high %v89_v45, %v93_v48  ;;  %v102_v41 = vld [vmem:[#allocation5 + $0x178] sm:$0xff]  ;;  %v1842_v45 = vcombine.low %v90_v28, %v94_v29  ;;  %v628_v28 = vld [vmem:[%s1945_s2] sm:$0x1]  ;;  %v639_v29 = vlaneseq  ;;  %s1568_s2 = smov [#allocation7]  }
  0x6f   :  { %v1844_v48 = vcombine.high %v98_v40, %v102_v41  ;;  %1460 = vrcp.f32 %v628_v28 }
  0x71   :  { %1071 = vmatpush1.bf16.msra.mxu1 %v1672_v26  ;;  %v97_v26 = vld [vmem:[#allocation5 + $0x150] sm:$0xff] }
  0x72   :  { %1072 = vmatprep.subr.bf16.mxu1 %v1675_v27  ;;  %v101_v27 = vld [vmem:[#allocation5 + $0x170] sm:$0xff] }
  0x74   :  { %550 = vmatpush1.bf16.xpose.msra.mxu0 %v1757_v32 }
  0x75   :  { %551 = vmatprep.subr.bf16.mxu0 %v1760_v33  ;;  %1073 = vmatpush1.bf16.msra.mxu1 %v1684_v34  ;;  %v1789_v34 = vcombine.high %v97_v26, %v101_v27 }
  0x76   :  { %1074 = vmatprep.subr.bf16.mxu1 %v1687_v35  ;;  %v105_v35 = vld [vmem:[#allocation5 + $0x190] sm:$0xff] }
  0x79   :  { %1075 = vmatpush1.bf16.msra.mxu1 %v1696_v42  ;;  %v109_v42 = vld [vmem:[#allocation5 + $0x1b0] sm:$0xff] }
  0x7a   :  { %1076 = vmatprep.subr.bf16.mxu1 %v1699_v43  ;;  %v1796_v43 = vcombine.low %v97_v26, %v101_v27  ;;  %v1804_v53 = vcombine.low %v105_v35, %v109_v42  ;;  %v106_v26 = vld [vmem:[#allocation5 + $0x198] sm:$0xff] }
  0x7b   :  { %v110_v27 = vld [vmem:[#allocation5 + $0x1b8] sm:$0xff] }
  0x7c   :  { %552 = vmatpush1.bf16.xpose.msra.mxu0 %v1765_v44 }
  0x7d   :  { %553 = vmatprep.subr.bf16.mxu0 %v1769_v15  ;;  %1077 = vmatpush1.bf16.msra.mxu1 %v1708_v50  ;;  %v1799_v50 = vcombine.high %v105_v35, %v109_v42  ;;  %v1848_v35 = vcombine.low %v98_v40, %v102_v41  ;;  %v1850_v42 = vcombine.high %v106_v26, %v110_v27  ;;  %v640_v40 = vshrl.u32 %v639_v29, 7 }
  0x7e   :  { %1078 = vmatprep.subr.bf16.mxu1 %v1711_v51  ;;  %v113_v51 = vld [vmem:[#allocation5 + $0x1d0] sm:$0xff] }
  0x7f   :  { %v1806_v56 = vcombine.high %v113_v51, %v117_v52  ;;  %1957 = vst [vmem:[#allocation14_spill] sm:$0xff] %v1848_v35  ;;  %1958 = vst [vmem:[#allocation15_spill] sm:$0xff] %v1850_v42  ;;  %v641_v41 = vsub.s32 0, %v640_v40 }
  0x81   :  { %1079 = vmatpush1.bf16.msra.mxu1 %v1720_v58  ;;  %v62_v58 = vld [vmem:[#allocation5 + $0x38] sm:$0xff] }
  0x82   :  { %1080 = vmatprep.subr.bf16.mxu1 %v1723_v59  ;;  %v1810_v59 = vcombine.low %v113_v51, %v117_v52  ;;  %v1812_v60 = vcombine.high %v58_v57, %v62_v58  ;;  %v114_v51 = vld [vmem:[#allocation5 + $0x1d8] sm:$0xff] }
  0x83   :  { %v118_v52 = vld [vmem:[#allocation5 + $0x1f8] sm:$0xff] }
  0x84   :  { %554 = vmatpush1.bf16.xpose.msra.mxu0 %v1776_v16  ;;  %v1860_v61 = vcombine.low %v114_v51, %v118_v52 }
  0x85   :  { %555 = vmatprep.subr.bf16.mxu0 %v1779_v21  ;;  %1081 = vmatpush1.bf16.msra.mxu1 %v1732_v2  ;;  %v1818_v2 = vcombine.low %v58_v57, %v62_v58  ;;  %v1854_v57 = vcombine.low %v106_v26, %v110_v27  ;;  %v1856_v58 = vcombine.high %v114_v51, %v118_v52  ;;  %v646_v51 = vand.u32 127, %v639_v29 }
  0x86   :  { %1082 = vmatprep.subr.bf16.mxu1 %v1735_v5  ;;  %1961 = vst [vmem:[#allocation18_spill] sm:$0xff] %v1860_v61 }
  0x87   :  { %1959 = vst [vmem:[#allocation16_spill] sm:$0xff] %v1854_v57  ;;  %1960 = vst [vmem:[#allocation17_spill] sm:$0xff] %v1856_v58  ;;  %vm647_vm0 = vcmp.lt.s32.totalorder %v646_v51, 64 }
  0x89   :  { %1083 = vmatpush1.bf16.msra.mxu1 %v1354_v24  ;;  %v1830_v24 = vcombine.low %v74_v10, %v78_v13 }
  0x8a   :  { %1111 = vmatprep.subr.bf16.mxu1 %v1640_v3  ;;  %v54_v3 = vld [vmem:[#allocation2 + $0x18] sm:$0xff] }
  0x8b   :  { %v1297_v5 = vcombine.high %v54_v3, %v54_v3  ;;  %v1296_v0 = vcombine.low %v54_v3, %v54_v3  ;;  %v1461_v3 = vpop.eup %1460 }
  0x8c   :  { %556 = vmatpush1.bf16.xpose.msra.mxu0 %v1786_v49 }
  0x8d   :  { %557 = vmatprep.subr.bf16.mxu0 %v1789_v34 }
  0x94   :  { %558 = vmatpush1.bf16.xpose.msra.mxu0 %v1796_v43 }
  0x95   :  { %559 = vmatprep.subr.bf16.mxu0 %v1799_v50 }
  0x9c   :  { %560 = vmatpush1.bf16.xpose.msra.mxu0 %v1804_v53 }
  0x9d   :  { %561 = vmatprep.subr.bf16.mxu0 %v1806_v56 }
  0xa4   :  { %562 = vmatpush1.bf16.xpose.msra.mxu0 %v1810_v59 }
  0xa5   :  { %587 = vmatprep.subr.bf16.mxu0 %v1812_v60 }
  0xab   :  { %580 = vmatmul.mubr.bf16.vlgmr.msra.gmra.mrb[0].mxu0 %v1294_v1  ;;  %v629_v1 = vld [vmem:[%s1947_s4] sm:$0xff]  ;;  %s1261_s4 = sshll.u32 %s1568_s2, 4  ;;  %s1262_s4 = int_to_ptr.vmem [resolvable:$true] %s1261_s4 }
  0xac   :  { %588 = vmatpush1.bf16.xpose.msra.mxu0 %v1818_v2  ;;  %619 = vmatprep.mubr.bf16.mxu0 %v1297_v5  ;;  %v658_v5 = vmul.u32 8, %v629_v1  ;;  %v642_v1 = vrot.slane %v1461_v3, %v641_v41  ;;  %s1510_s26 = scalar_lea.vmem %s1262_s4, 256  ;;  %p1515_p3 = scmp.lt.s32.totalorder %s1262_s4, %s1262_s4 }
  0xad   :  { %589 = vmatprep.subr.bf16.mxu0 %v1820_v8  ;;  %p1511_p2 = scmp.ne.s32.totalorder %s1262_s4, %s1510_s26  ;;  %p1516_p4 = scmp.lt.s32.totalorder %s1510_s26, %s1510_s26 }
  0xae   :  { %660 = vperm.xlu1 %1449, %v658_v5   ;;  %v663_v40 = vadd.s32 8, %v658_v5 }
  0xaf   :  { %p1517_p5 = por %p1516_p4, %p1515_p3 }
  0xb1   :  { %p1518_p6 = pnand %p1517_p5, %p1511_p2 }
  0xb4   :  { %590 = vmatpush1.bf16.xpose.msra.mxu0 %v1824_v14 }
  0xb5   :  { %591 = vmatprep.subr.bf16.mxu0 %v1826_v17 }
  0xbc   :  { %592 = vmatpush1.bf16.xpose.msra.mxu0 %v1830_v24 }
  0xbd   :  { %593 = vmatprep.subr.bf16.mxu0 %v1832_v25 }
  0xc4   :  { %594 = vmatpush1.bf16.xpose.msra.mxu0 %v1836_v36 }
  0xc5   :  { %595 = vmatprep.subr.bf16.mxu0 %v1838_v37  ;;  %v635_v27 = vpop.permute.xlu0 %634 }
  0xcc   :  { %596 = vmatpush1.bf16.xpose.msra.mxu0 %v1842_v45 }
  0xcd   :  { %597 = vmatprep.subr.bf16.mxu0 %v1844_v48 }
  0xd4   :  { %598 = vmatpush1.bf16.xpose.msra.mxu0 %v1848_v35 }
  0xd5   :  { %599 = vmatprep.subr.bf16.mxu0 %v1850_v42 }
  0xdc   :  { %600 = vmatpush1.bf16.xpose.msra.mxu0 %v1854_v57 }
  0xdd   :  { %601 = vmatprep.subr.bf16.mxu0 %v1856_v58 }
  0xe4   :  { %602 = vmatpush1.bf16.xpose.msra.mxu0 %v1860_v61 }
  0xeb   :  { %620 = vmatmul.mubr.bf16.vlgmr.msra.gmra.mrb[0].mxu0 %v1296_v0 }
 0x12d   :  { %v661_v35 = vpop.permute.xlu1 %660 }
 0x12e   :  { %vm662_vm2 = vcmp.ge.s32.totalorder %v646_v51, %v661_v35 }
 0x13e   :  { %v501_v10 = vpop.f32.mrb[0].mxu1 }
 0x13f   :  { %v503_v13 = vpop.f32.mrb[1].mxu1 }
 0x140   :  { %v504_v9 = vpop.f32.mrb[2].mxu1 }
 0x141   :  { %v505_v19 = vpop.f32.mrb[3].mxu1 }
 0x1be   :  { %v621_v26 = vpop.f32.mrb[0].mxu0 }
 0x1bf   :  { %v1427_v52 = vadd.f32 %v621_v26, %v501_v10  ;;  %v623_v0 = vpop.f32.mrb[1].mxu0 }
 0x1c0   :  { %v624_v7 = vpop.f32.mrb[2].mxu0  ;;  %v1962_v0 = vmov 0  }
 0x1c1   :  { %v637_v61 = vmul.f32 %v1427_v52, %v635_v27  ;;  %v625_v13 = vpop.f32.mrb[3].mxu0 }
 0x1c3   :  { %v644_v9 = vmul.f32 %v642_v1, %v637_v61  ;;  %v1567_v61 = vmov 0.0  }
 0x1c5   :  { %v648_v19 = vsel %vm647_vm0, %v644_v9, -1e+30 }
 0x1c6   :  { %649 = vmax.xlane.f32.xlu0 %v648_v19 }
 0x253   :  { %v650_v58 = vpop.xlane.xlu0 %649 }
 0x254   :  { %v651_v57 = vsub.f32 %v648_v19, %v650_v58 }
 0x256   :  { %v652_v28 = vmul.f32 1.442695, %v651_v57 }
 0x258   :  { %1462 = vpow2.f32 %v652_v28 }
 0x262   :  { %v1463_v42 = vpop.eup %1462 }
 0x263   :  { %654 = vadd.xlane.f32.xlu1 %v1463_v42 }
 0x274   :  { %665 = vperm.xlu1 %1449, %v663_v40  }
 0x2f0   :  { %v655_v29 = vpop.xlane.xlu1 %654 }
 0x2f1   :  { %1464 = vrcp.f32 %v655_v29 }
 0x2f4   :  { %v666_v10 = vpop.permute.xlu1 %665 }
 0x2f5   :  { %vm667_vm1 = vcmp.lt.s32.totalorder %v646_v51, %v666_v10 }
 0x2f6   :  { %vm668_vm3 = vmand %vm662_vm2, %vm667_vm1 }
 0x2f7   :  { %v1362_v3 = vsel %vm668_vm3, 1.0, %v1567_v61 }
 0x2fb   :  { %v1465_v7 = vpop.eup %1464 }
 0x2fc   :  { %v657_v41 = vmul.f32 %v1465_v7, %v1463_v42 }
 0x2fe   :  { %v671_v26 = vmul.f32 %v1362_v3, %v657_v41 }
 0x300   :  { %v672_v27 = vsub.f32 %v657_v41, %v671_v26  ;;  %673 = vst [vmem:[#allocation7] sm:$0xff] %v671_v26  ;;  %v675_v58 = vpack.c.bf16 %v671_v26, %v671_v26 }
 0x302   :  { %674 = vst [vmem:[#allocation7 + $0x8] sm:$0xff] %v672_v27  ;;  %v676_v57 = vpack.c.bf16 %v672_v27, %v672_v27 }
 0x304   :  { %v678_v5 = vrot.slane %v676_v57, 4 }
 0x306   :  { %v682_v52 = vsel %vm679_vm4, %v675_v58, %v678_v5 }
 0x307   :  { %1101 = vmatmul.mubr.bf16.vlgmr.msra.gmra.mrb[4].mxu1 %v682_v52 }
 0x308   :  { %1112 = vmatpush1.bf16.msra.mxu1 %v1642_v4  ;;  %1143 = vmatprep.mubr.bf16.mxu1 %v1962_v0  ;;  %v1963_v4 = vld [vmem:[#allocation14_spill] sm:$0xff] }
 0x309   :  { %1113 = vmatprep.subr.bf16.mxu1 %v1644_v6  ;;  %v1964_v6 = vld [vmem:[#allocation15_spill] sm:$0xff] }
 0x30c   :  { %1114 = vmatpush1.bf16.msra.mxu1 %v1653_v11  ;;  %v1965_v11 = vld [vmem:[#allocation16_spill] sm:$0xff] }
 0x30d   :  { %1115 = vmatprep.subr.bf16.mxu1 %v1655_v12  ;;  %v1966_v12 = vld [vmem:[#allocation17_spill] sm:$0xff] }
 0x310   :  { %1116 = vmatpush1.bf16.msra.mxu1 %v1667_v22  ;;  %v1967_v22 = vld [vmem:[#allocation18_spill] sm:$0xff] }
 0x311   :  { %1117 = vmatprep.subr.bf16.mxu1 %v1670_v23 }
 0x314   :  { %1118 = vmatpush1.bf16.msra.mxu1 %v1679_v30 }
 0x315   :  { %1119 = vmatprep.subr.bf16.mxu1 %v1682_v31 }
 0x318   :  { %1120 = vmatpush1.bf16.msra.mxu1 %v1691_v38 }
 0x319   :  { %1121 = vmatprep.subr.bf16.mxu1 %v1694_v39 }
 0x31c   :  { %1122 = vmatpush1.bf16.msra.mxu1 %v1703_v46 }
 0x31d   :  { %1123 = vmatprep.subr.bf16.mxu1 %v1706_v47 }
 0x320   :  { %1124 = vmatpush1.bf16.msra.mxu1 %v1715_v54 }
 0x321   :  { %1125 = vmatprep.subr.bf16.mxu1 %v1718_v55 }
 0x324   :  { %1126 = vmatpush1.bf16.msra.mxu1 %v1727_v62 }
 0x325   :  { %1154 = vmatprep.subr.bf16.mxu1 %v1730_v63 }
 0x327   :  { %1144 = vmatmul.mubr.bf16.vlgmr.msra.gmra.mrb[8].mxu1 %v682_v52 }
 0x328   :  { %1155 = vmatpush1.bf16.msra.mxu1 %v1743_v18  ;;  %1186 = vmatprep.mubr.bf16.mxu1 %v1962_v0 }
 0x329   :  { %1156 = vmatprep.subr.bf16.mxu1 %v1748_v20 }
 0x32c   :  { %1157 = vmatpush1.bf16.msra.mxu1 %v1757_v32 }
 0x32d   :  { %1158 = vmatprep.subr.bf16.mxu1 %v1760_v33 }
 0x330   :  { %1159 = vmatpush1.bf16.msra.mxu1 %v1765_v44 }
 0x331   :  { %1160 = vmatprep.subr.bf16.mxu1 %v1769_v15 }
 0x334   :  { %1161 = vmatpush1.bf16.msra.mxu1 %v1776_v16 }
 0x335   :  { %1162 = vmatprep.subr.bf16.mxu1 %v1779_v21 }
 0x338   :  { %1163 = vmatpush1.bf16.msra.mxu1 %v1786_v49 }
 0x339   :  { %1164 = vmatprep.subr.bf16.mxu1 %v1789_v34 }
 0x33c   :  { %1165 = vmatpush1.bf16.msra.mxu1 %v1796_v43 }
 0x33d   :  { %1166 = vmatprep.subr.bf16.mxu1 %v1799_v50 }
 0x340   :  { %1167 = vmatpush1.bf16.msra.mxu1 %v1804_v53 }
 0x341   :  { %1168 = vmatprep.subr.bf16.mxu1 %v1806_v56 }
 0x344   :  { %1169 = vmatpush1.bf16.msra.mxu1 %v1810_v59 }
 0x345   :  { %1197 = vmatprep.subr.bf16.mxu1 %v1812_v60 }
 0x347   :  { %1187 = vmatmul.mubr.bf16.vlgmr.msra.gmra.mrb[12].mxu1 %v682_v52 }
 0x348   :  { %1198 = vmatpush1.bf16.msra.mxu1 %v1818_v2  ;;  %1229 = vmatprep.mubr.bf16.mxu1 %v1962_v0 }
 0x349   :  { %1199 = vmatprep.subr.bf16.mxu1 %v1820_v8 }
 0x34c   :  { %1200 = vmatpush1.bf16.msra.mxu1 %v1824_v14 }
 0x34d   :  { %1201 = vmatprep.subr.bf16.mxu1 %v1826_v17 }
 0x350   :  { %1202 = vmatpush1.bf16.msra.mxu1 %v1830_v24 }
 0x351   :  { %1203 = vmatprep.subr.bf16.mxu1 %v1832_v25 }
 0x354   :  { %1204 = vmatpush1.bf16.msra.mxu1 %v1836_v36 }
 0x355   :  { %1205 = vmatprep.subr.bf16.mxu1 %v1838_v37 }
 0x358   :  { %1206 = vmatpush1.bf16.msra.mxu1 %v1842_v45 }
 0x359   :  { %1207 = vmatprep.subr.bf16.mxu1 %v1844_v48 }
 0x35c   :  { %1208 = vmatpush1.bf16.msra.mxu1 %v1963_v4 }
 0x35d   :  { %1209 = vmatprep.subr.bf16.mxu1 %v1964_v6 }
 0x360   :  { %1210 = vmatpush1.bf16.msra.mxu1 %v1965_v11 }
 0x361   :  { %1211 = vmatprep.subr.bf16.mxu1 %v1966_v12 }
 0x364   :  { %1212 = vmatpush1.bf16.msra.mxu1 %v1967_v22 }
 0x367   :  { %1230 = vmatmul.mubr.bf16.vlgmr.msra.gmra.mrb[16].mxu1 %v682_v52 }
 0x368   :  { %1521 = shalt.err (!%p1518_p6)
}
 0x369   :  { %s1522_s29 = scalar_lea.hbm %s1948_s5, 256 }
 0x36a   :  { %p1523_p7 = scmp.ne.s32.totalorder %s1948_s5, %s1522_s29  ;;  %p1526_p8 = scmp.lt.u32.totalorder %s1522_s29, %s1948_s5 }
 0x36c   :  { %p1528_p9 = pnand %p1526_p8, %p1523_p7 }
 0x36e   :  { %1531 = shalt.err (!%p1528_p9)
}
 0x36f   :  { %s1569_s10 = smov 128   ;;  %s1570_s11 = smov 8  }
 0x370   :  { %1267 = dma.vmem_to_hbm [thread:$0]  %s1262_s4, 256, %s1948_s5, [#allocation4], %s1569_s10, %s1569_s10, %s1570_s11  }
 0x371   :  { %s1571_s5 = smov [#allocation8]  }
 0x372   :  { %s1273_s14 = sshll.u32 %s1571_s5, 4  ;;  %s1274_s14 = int_to_ptr.vmem [resolvable:$true] %s1273_s14 }
 0x373   :  { %s1532_s15 = scalar_lea.vmem %s1274_s14, 2048  ;;  %p1537_p11 = scmp.lt.s32.totalorder %s1274_s14, %s1274_s14 }
 0x374   :  { %p1533_p10 = scmp.ne.s32.totalorder %s1274_s14, %s1532_s15  ;;  %p1538_p12 = scmp.lt.s32.totalorder %s1532_s15, %s1532_s15 }
 0x376   :  { %p1539_p13 = por %p1538_p12, %p1537_p11 }
 0x378   :  { %p1540_p0 = pnand %p1539_p13, %p1533_p10 }
 0x3da   :  { %v1102_v23 = vpop.f32.mrb[4].mxu1 }
 0x3db   :  { %1240 = vst [vmem:[#allocation8] sm:$0xff] %v1102_v23  ;;  %v1104_v30 = vpop.f32.mrb[5].mxu1 }
 0x3dc   :  { %1241 = vst [vmem:[#allocation8 + $0x8] sm:$0xff] %v1104_v30  ;;  %v1106_v31 = vpop.f32.mrb[6].mxu1 }
 0x3dd   :  { %1248 = vst [vmem:[#allocation8 + $0x40] sm:$0xff] %v1106_v31  ;;  %v1108_v38 = vpop.f32.mrb[7].mxu1 }
 0x3de   :  { %1249 = vst [vmem:[#allocation8 + $0x48] sm:$0xff] %v1108_v38 }
 0x3fa   :  { %v1145_v39 = vpop.f32.mrb[8].mxu1 }
 0x3fb   :  { %1242 = vst [vmem:[#allocation8 + $0x10] sm:$0xff] %v1145_v39  ;;  %v1147_v46 = vpop.f32.mrb[9].mxu1 }
 0x3fc   :  { %1243 = vst [vmem:[#allocation8 + $0x18] sm:$0xff] %v1147_v46  ;;  %v1149_v47 = vpop.f32.mrb[10].mxu1 }
 0x3fd   :  { %1250 = vst [vmem:[#allocation8 + $0x50] sm:$0xff] %v1149_v47  ;;  %v1151_v54 = vpop.f32.mrb[11].mxu1 }
 0x3fe   :  { %1251 = vst [vmem:[#allocation8 + $0x58] sm:$0xff] %v1151_v54 }
 0x41a   :  { %v1188_v55 = vpop.f32.mrb[12].mxu1 }
 0x41b   :  { %1244 = vst [vmem:[#allocation8 + $0x20] sm:$0xff] %v1188_v55  ;;  %v1190_v62 = vpop.f32.mrb[13].mxu1 }
 0x41c   :  { %1245 = vst [vmem:[#allocation8 + $0x28] sm:$0xff] %v1190_v62  ;;  %v1192_v63 = vpop.f32.mrb[14].mxu1 }
 0x41d   :  { %1252 = vst [vmem:[#allocation8 + $0x60] sm:$0xff] %v1192_v63  ;;  %v1194_v18 = vpop.f32.mrb[15].mxu1 }
 0x41e   :  { %1253 = vst [vmem:[#allocation8 + $0x68] sm:$0xff] %v1194_v18 }
 0x43a   :  { %v1231_v20 = vpop.f32.mrb[16].mxu1 }
 0x43b   :  { %1246 = vst [vmem:[#allocation8 + $0x30] sm:$0xff] %v1231_v20  ;;  %v1233_v32 = vpop.f32.mrb[17].mxu1 }
 0x43c   :  { %1247 = vst [vmem:[#allocation8 + $0x38] sm:$0xff] %v1233_v32  ;;  %v1235_v33 = vpop.f32.mrb[18].mxu1 }
 0x43d   :  { %1254 = vst [vmem:[#allocation8 + $0x70] sm:$0xff] %v1235_v33  ;;  %v1237_v44 = vpop.f32.mrb[19].mxu1 }
 0x43e   :  { %1255 = vst [vmem:[#allocation8 + $0x78] sm:$0xff] %v1237_v44 }
 0x43f   :  { %1543 = shalt.err (!%p1540_p0)
}
 0x440   :  { %s1544_s18 = scalar_lea.hbm %s1949_s6, 2048 }
 0x441   :  { %p1545_p1 = scmp.ne.s32.totalorder %s1949_s6, %s1544_s18  ;;  %p1548_p2 = scmp.lt.u32.totalorder %s1544_s18, %s1949_s6 }
 0x443   :  { %p1550_p3 = pnand %p1548_p2, %p1545_p1 }
 0x445   :  { %1553 = shalt.err (!%p1550_p3)
}
 0x446   :  { %s1572_s1 = smov 1024   ;;  %s1573_s22 = smov 64  }
 0x447   :  { %1279 = dma.vmem_to_hbm [thread:$0]  %s1274_s14, 2048, %s1949_s6, [#allocation9], %s1572_s1, %s1572_s1, %s1573_s22  }
 0x448   :  { %1558 = dma.done.wait [#allocation4], 256  }
 0x449   :  { %1559 = vsyncadd [#allocation4], 4294967040 }
 0x44a   :  { %1560 = dma.done.wait [#allocation9], 2048  }
 0x44b   :  { %1561 = vsyncadd [#allocation9], 4294965248 }
 0x44c   :  { %1286 = vsyncpa [#allocation3], 1 }
 0x44d   :  { %1287 = vsyncpa [#allocation6], 1 }
 0x44e   :  { %1288 = vsyncpa [#allocation4], 1 }
 0x44f   :  { %1289 = vsyncpa [#allocation9], 1 }

</bundles_post_ra>
